<compile_context>
chip_gen: v6e
topology: v6e:2x2x1
jax: 0.10.0
libtpu: 0.0.40
codegen_flags: <defaults>
</compile_context>

<pallas_src>
import functools

import jax
import jax.numpy as jnp
from jax.experimental import pallas as pl
from jax.experimental.pallas import tpu as pltpu


def _adj_kernel(a_ref, o_ref, *, soft: bool):
    i = pl.program_id(0)
    j = pl.program_id(1)

    def fwd_value():
        a = a_ref[...]
        if soft:
            return a
        return (a > 0.5).astype(a.dtype)

    @pl.when(j > i)          # strictly above the diagonal: zeros, no read
    def _():
        o_ref[...] = jnp.zeros_like(o_ref)

    @pl.when(j < i)          # strictly below: plain threshold / copy
    def _():
        o_ref[...] = fwd_value().astype(o_ref.dtype)

    @pl.when(j == i)         # diagonal tile: local strict-lower-tri mask
    def _():
        out = fwd_value()
        row = jax.lax.broadcasted_iota(jnp.int32, out.shape, 0)
        col = jax.lax.broadcasted_iota(jnp.int32, out.shape, 1)
        o_ref[...] = jnp.where(col < row, out,
                               jnp.zeros_like(out)).astype(o_ref.dtype)


def _default_tile() -> int:
    try:
        kind = jax.devices()[0].device_kind.lower()
    except Exception:
        return 512
    if "v6" in kind:
        return 1024   # 128 MiB VMEM / 32 MiB scoped default: 4 x 4 MiB fits
    return 512        # safe for v5e (16 MiB scoped default) and v7x (64 MiB)


def _adj_forward_pallas(adj_matrix: jax.Array, soft: bool, tile: int) -> jax.Array:
    n, _ = adj_matrix.shape
    t = min(tile, n)
    grid = (pl.cdiv(n, t), pl.cdiv(n, t))
    kernel = functools.partial(_adj_kernel, soft=soft)
    return pl.pallas_call(
        kernel,
        out_shape=jax.ShapeDtypeStruct((n, n), adj_matrix.dtype),
        grid=grid,
        # Upper-triangle steps (j > i) never read the input, so point them at
        # the resident (i, i) block -> Pallas skips the redundant DMA.
        in_specs=[pl.BlockSpec((t, t), lambda i, j: (i, jnp.minimum(i, j)))],
        out_specs=pl.BlockSpec((t, t), lambda i, j: (i, j)),
        compiler_params=pltpu.CompilerParams(
            dimension_semantics=("parallel", "parallel")),
    )(adj_matrix)


def _adj_forward_value(adj_matrix: jax.Array, soft: bool, tile) -> jax.Array:
    n, m = adj_matrix.shape
    assert n == m, "adjacency matrix must be square"
    if tile is None:
        tile = _default_tile()
    if n < 128:
        # Tiny matrices: Pallas launch overhead + lane-sparse masked stores
        # dominate; plain XLA is strictly better here.
        out = adj_matrix if soft else (adj_matrix > 0.5).astype(adj_matrix.dtype)
        return jnp.tril(out, k=-1)
    return _adj_forward_pallas(adj_matrix, soft, tile)


@functools.partial(jax.custom_vjp, nondiff_argnums=(1, 2))
def adj_matrix_forward(adj_matrix: jax.Array, soft: bool = False, tile=None):
    """Pallas implementation of ADJMatrix.forward (forward value)."""
    return _adj_forward_value(adj_matrix, soft, tile)


def _adj_fwd(adj_matrix, soft, tile):
    return _adj_forward_value(adj_matrix, soft, tile), None


def _adj_bwd(soft, tile, _residual, g):
    # Both the soft path and the straight-through hard path have
    # d out / d adj == strictly-lower-triangular identity.
    return (jnp.tril(g, k=-1),)


adj_matrix_forward.defvjp(_adj_fwd, _adj_bwd)


def _reference(adj_matrix: jax.Array, soft: bool) -> jax.Array:
    out = adj_matrix if soft else (adj_matrix > 0.5).astype(adj_matrix.dtype)
    return jnp.tril(out, k=-1)


if __name__ == "__main__":
    key = jax.random.PRNGKey(0)
    ok = True

    # (n, explicit tile): tiny fallback, multi-tile Pallas grid, device-default tile.
    cases = [(16, None), (256, 128), (1024, None)]
    for n, tile in cases:
        k1, key = jax.random.split(key)
        adj_rand = jax.random.uniform(k1, (n, n), dtype=jnp.float32)
        adj_ones = jnp.ones((n, n), dtype=jnp.float32)   # nn.Parameter init
        for adj in (adj_ones, adj_rand):
            for soft in (False, True):
                out = adj_matrix_forward(adj, soft, tile)
                jax.block_until_ready(out)
                ref = _reference(adj, soft)
                if not jnp.allclose(out, ref, atol=1e-6):
                    ok = False

    # Straight-through-estimator gradient via the custom_vjp wrapper.
    k1, key = jax.random.split(key)
    adj = jax.random.uniform(k1, (256, 256), dtype=jnp.float32)
    g = jax.grad(lambda a: adj_matrix_forward(a, False, 128).sum())(adj)
    jax.block_until_ready(g)
    if not jnp.allclose(g, jnp.tril(jnp.ones_like(adj), k=-1), atol=1e-6):
        ok = False

    print("KERNEL_OK" if ok else "KERNEL_MISMATCH")
</pallas_src>

<mosaic_0001>
module attributes {stable_mosaic.version = 11 : i64} {
  func.func @_adj_kernel(%arg0: i32, %arg1: i32, %arg2: memref<128x128xf32, #tpu.memory_space<vmem>>, %arg3: memref<128x128xf32, #tpu.memory_space<vmem>>) attributes {dimension_semantics = [#tpu.dimension_semantics<parallel>, #tpu.dimension_semantics<parallel>], iteration_bounds = array<i64: 2, 2>, scalar_prefetch = 0 : i64, scratch_operands = 0 : i64, tpu.core_type = #tpu.core_type<tc>, window_params = [{transform_indices = @transform_0, window_bounds = array<i64: 128, 128>}, {transform_indices = @transform_1, window_bounds = array<i64: 128, 128>}]} {
    %0 = arith.cmpi sgt, %arg1, %arg0 : i32
    %1 = arith.extui %0 : i1 to i32
    %c0_i32 = arith.constant 0 : i32
    %2 = arith.cmpi ne, %1, %c0_i32 : i32
    scf.if %2 {
      %cst = arith.constant 0.000000e+00 : f32
      %9 = vector.broadcast %cst : f32 to vector<128x128xf32>
      %c0 = arith.constant 0 : index
      %c0_2 = arith.constant 0 : index
      %10 = vector.load %arg3[%c0, %c0_2] : memref<128x128xf32, #tpu.memory_space<vmem>>, vector<128x128xf32>
      tpu.vector_store %arg3[%c0, %c0_2], %9 {strides = array<i32>} : memref<128x128xf32, #tpu.memory_space<vmem>>, vector<128x128xf32>,
    } else {
    }
    %3 = arith.cmpi slt, %arg1, %arg0 : i32
    %4 = arith.extui %3 : i1 to i32
    %c0_i32_0 = arith.constant 0 : i32
    %5 = arith.cmpi ne, %4, %c0_i32_0 : i32
    scf.if %5 {
      %c0 = arith.constant 0 : index
      %c0_2 = arith.constant 0 : index
      %9 = vector.load %arg2[%c0, %c0_2] : memref<128x128xf32, #tpu.memory_space<vmem>>, vector<128x128xf32>
      %cst = arith.constant 5.000000e-01 : f32
      %10 = vector.broadcast %cst : f32 to vector<128x128xf32>
      %11 = arith.cmpf ogt, %9, %10 : vector<128x128xf32>
      %12 = arith.extui %11 : vector<128x128xi1> to vector<128x128xi32>
      %13 = arith.sitofp %12 : vector<128x128xi32> to vector<128x128xf32>
      %c0_3 = arith.constant 0 : index
      %c0_4 = arith.constant 0 : index
      %14 = vector.load %arg3[%c0_3, %c0_4] : memref<128x128xf32, #tpu.memory_space<vmem>>, vector<128x128xf32>
      tpu.vector_store %arg3[%c0_3, %c0_4], %13 {strides = array<i32>} : memref<128x128xf32, #tpu.memory_space<vmem>>, vector<128x128xf32>,
    } else {
    }
    %6 = arith.cmpi eq, %arg1, %arg0 : i32
    %7 = arith.extui %6 : i1 to i32
    %c0_i32_1 = arith.constant 0 : i32
    %8 = arith.cmpi ne, %7, %c0_i32_1 : i32
    scf.if %8 {
      %c0 = arith.constant 0 : index
      %c0_2 = arith.constant 0 : index
      %9 = vector.load %arg2[%c0, %c0_2] : memref<128x128xf32, #tpu.memory_space<vmem>>, vector<128x128xf32>
      %cst = arith.constant 5.000000e-01 : f32
      %10 = vector.broadcast %cst : f32 to vector<128x128xf32>
      %11 = arith.cmpf ogt, %9, %10 : vector<128x128xf32>
      %12 = arith.extui %11 : vector<128x128xi1> to vector<128x128xi32>
      %13 = arith.sitofp %12 : vector<128x128xi32> to vector<128x128xf32>
      %14 = tpu.iota {dimensions = array<i32: 0>} : vector<128x128xi32>
      %15 = tpu.iota {dimensions = array<i32: 1>} : vector<128x128xi32>
      %16 = arith.cmpi slt, %15, %14 : vector<128x128xi32>
      %cst_3 = arith.constant 0.000000e+00 : f32
      %17 = vector.broadcast %cst_3 : f32 to vector<128x128xf32>
      %18 = arith.select %16, %13, %17 : vector<128x128xi1>, vector<128x128xf32>
      %c0_4 = arith.constant 0 : index
      %c0_5 = arith.constant 0 : index
      %19 = vector.load %arg3[%c0_4, %c0_5] : memref<128x128xf32, #tpu.memory_space<vmem>>, vector<128x128xf32>
      tpu.vector_store %arg3[%c0_4, %c0_5], %18 {strides = array<i32>} : memref<128x128xf32, #tpu.memory_space<vmem>>, vector<128x128xf32>,
    } else {
    }
    return
  }
  func.func @transform_0(%arg0: i32, %arg1: i32) -> (i32, i32) {
    %0 = arith.minsi %arg0, %arg1 : i32
    %c0_i32 = arith.constant 0 : i32
    return %arg0, %0 : i32, i32
  }
  func.func @transform_1(%arg0: i32, %arg1: i32) -> (i32, i32) {
    %c0_i32 = arith.constant 0 : i32
    return %arg0, %arg1 : i32, i32
  }
}

</mosaic_0001>

<bundles_post_ra>
// kernel: tpu_custom_call.1
= control target key start
LH: loop header
LB: loop body
LE: loop exit
PB: predicated region body
PF: predicated region fallthrough
CT: control target
= control target key end

     0   :  { %6 = vsyncpa [#allocation3], 0  ;;  %s1194_s0 = inlined_call_operand.hbm [shape: f32[256,256], index: 0, kind: input, shape index: {}]   ;;  %s1195_s1 = inlined_call_operand.hbm [shape: f32[256,256], index: 1, kind: output, shape index: {}]  }
   0x1   :  { %8 = vsyncpa [#allocation3 + $0x1], 0 }
   0x2   :  { %9 = vsyncpa [#allocation4], 0 }
   0x3   :  { %11 = vsyncpa [#allocation4 + $0x1], 0  ;;  %s842_s6 = smov 0   ;;  %s844_s7 = smov 0  }
   0x4   :  { %s846_s8 = smov 0   ;;  %s848_s9 = smov 0  }
   0x5   :  { %s850_s10 = smov 0   ;;  %s852_s11 = smov 0  }
   0x6   :  { %s854_s12 = smov 0   ;;  %s856_s13 = smov 0  }
   0x7   :  { %s858_s14 = smov 0   ;;  %s860_s15 = smov 0  }
   0x8   :  { %s862_s16 = smov 0  }
   0x9 LB: > { %1199 = sst [smem:[#allocation8_spill]] %s811_s14  ;;  %s506_s17 = sadd.s32 4294967295, %s819_s16   ;;  %s819_s16 = sphi %s862_s16, %s17_s16   ;;  %s815_s15 = sphi %s860_s15, %s1217_s15   ;;  %s811_s14 = sphi %s858_s14, %s1208_s14   ;;  %s807_s13 = sphi %s856_s13, %s1216_s13   ;;  %s803_s12 = sphi %s854_s12, %s1207_s12   ;;  %s799_s11 = sphi %s852_s11, %s1215_s11   ;;  %s795_s10 = sphi %s850_s10, %s1214_s10   ;;  %s791_s9 = sphi %s848_s9, %s1213_s9   ;;  %s787_s8 = sphi %s846_s8, %s1212_s8   ;;  %s783_s7 = sphi %s844_s7, %s1211_s7   ;;  %s779_s6 = sphi %s842_s6, %s1210_s6  }
   0xa   : > { %s507_s18 = sadd.s32 4294967294, %s819_s16   ;;  %s26_s19 = sadd.s32 1, %s811_s14 }
   0xb   : > { %s29_s20 = sadd.s32 1, %s815_s15  ;;  %p27_p0 = scmp.ge.s32.totalorder %s26_s19, 2 }
   0xc   : > { %p33_p1 = scmp.lt.s32.totalorder %s815_s15, %s811_s14  ;;  %s42_s21 = sadd.s32 1, %s799_s11 }
   0xd   : > { %p49_p2 = scmp.ne.s32.totalorder %s799_s11, %s795_s10  ;;  %s1219_s19 = smov (%p27_p0, %s26_s19), 0 }
   0xe   : > { %1200 = sst [smem:[#allocation9_spill]] %s1219_s19  ;;  %s1221_s20 = smov (!%p27_p0, %s29_s20), %s815_s15 }
   0xf   : > { %s909_s22 = scalar_select %p33_p1, %s815_s15, %s811_s14 }
  0x10   : > { %p31_p3 = scmp.ge.s32.totalorder %s1221_s20, 2  ;;  %p50_p4 = scmp.eq.s32.totalorder %s819_s16, 0 }
  0x11   : > { %p55_p5 = scmp.ne.s32.totalorder %s795_s10, %s791_s9  ;;  %p56_p6 = scmp.eq.s32.totalorder %s506_s17, 0 }
  0x12   : > { %s1223_s20 = smov (%p31_p3, %s1221_s20), 0  ;;  %p915_p7 = por %p50_p4, %p49_p2 }
  0x13   : > { %1201 = sst [smem:[#allocation10_spill]] %s1223_s20  ;;  %p919_p8 = por %p56_p6, %p55_p5 }
  0x14   : > { %p35_p9 = scmp.lt.s32.totalorder %s1223_s20, %s1219_s19  ;;  %s37_s25 = ssub.s32 %s815_s15, %s1223_s20 }
  0x15   : > { %s66_s26 = ssub.s32 %s811_s14, %s1219_s19  ;;  %s70_s27 = sadd.s32 1, %s787_s8 }
  0x16   : > { %s36_s28 = scalar_select %p35_p9, %s1223_s20, %s1219_s19 }
  0x17   : > { %s67_s29 = sor.u32 %s66_s26, %s37_s25  ;;  %p80_p10 = scmp.ne.s32.totalorder %s787_s8, %s783_s7 }
  0x18   : > { %s38_s30 = ssub.s32 %s909_s22, %s36_s28  ;;  %p68_p11 = scmp.eq.s32.totalorder %s67_s29, 0 }
  0x19   : > { %s39_s2 = sor.u32 %s38_s30, %s37_s25  ;;  %p81_p12 = scmp.eq.s32.totalorder %s506_s17, 3 }
  0x1a   : > { %p40_p13 = scmp.eq.s32.totalorder %s39_s2, 0  ;;  %p86_p0 = scmp.ne.s32.totalorder %s783_s7, %s779_s6 }
  0x1b   : > { %s938_s3 = scalar_select %p68_p11, %s787_s8, %s70_s27  }
  0x1c   : > { %s941_s4 = scalar_select %p40_p13, %s799_s11, %s42_s21  }
  0x1d   : > { %p943_p1 = por %p81_p12, %p80_p10  ;;  %p87_p2 = scmp.eq.s32.totalorder %s507_s18, 3 }
  0x1e   : > { %p572_p3 = scmp.lt.s32.totalorder %s819_s16, 4  ;;  %s107_s25 = sand.u32 1, %s799_s11  }
  0x1f   : > { %p950_p4 = por %p87_p2, %p86_p0  ;;  %s510_s17 = sshll.u32 %s107_s25, 7 }
  0x20   : > { %s558_s26 = sshll.u32 %s815_s15, 5  ;;  %s111_s29 = scalar_lea.vmem [#allocation2], %s510_s17 }
  0x21   : > { %s119_s28 = sadd.s32 %s558_s26, %s909_s22  ;;  %s122_s27 = sshll.u32 %s111_s29, 4  ;;  %s123_s27 = int_to_ptr.vmem [resolvable:$true] %s122_s27 }
  0x22   : > { %s513_s30 = sshll.u32 %s119_s28, 7  ;;  %p962_p5 = pnand %p572_p3, %p915_p7 }
  0x23   : > { %s121_s20 = scalar_lea.hbm %s1194_s0, %s513_s30  ;;  %s108_s19 = scalar_lea.sflag [#allocation3], %s107_s25 }
  0x24   : > { %p673_p6 = pneg %p962_p5  ;;  %s684_s14 = scalar_lea.vmem %s123_s27, 2048 }
  0x25   : > { %p685_p9 = scmp.ne.s32.totalorder %s123_s27, %s684_s14  ;;  %s821_s22 = smov [#allocation2]  }
  0x26   : > { %s689_s17 = sshll.u32 %s821_s22, 4  ;;  %s690_s17 = int_to_ptr.vmem [resolvable:$false] %s689_s17 }
  0x27   : > { %p687_p10 = pnand %p685_p9, %p673_p6  ;;  %s691_s26 = scalar_lea.vmem %s690_s17, 4096 }
  0x28   : > { %p692_p12 = scmp.lt.s32.totalorder %s123_s27, %s690_s17  ;;  %p693_p13 = scmp.lt.s32.totalorder %s691_s26, %s684_s14 }
  0x29   : > { %p688_p11 = pneg %p687_p10 }
  0x2a   : > { %p694_p0 = por %p693_p13, %p692_p12 }
  0x2c   : > { %p695_p2 = pnand %p694_p0, %p688_p11 }
  0x2e   : > { %698 = shalt.err (!%p695_p2)
}
  0x2f   : > { %s822_s23 = smov 256   ;;  %s823_s25 = smov 128  }
  0x30   : > { %s824_s28 = smov 8   ;;  %p514_p7 = scmp.ge.s32.totalorder %s819_s16, 1 }
  0x31   : > { %567 = dma.hbm_to_vmem [thread:$0]  (!%p962_p5), %s121_s20, 2048, %s123_s27, %s108_s19, %s822_s23, %s823_s25, %s824_s28  }
  0x32   : > { %p130_p3 = scmp.lt.s32.totalorder %s819_s16, 5 }
  0x34   : > { %p131_p6 = pnand %p514_p7, %p130_p3 }
  0x35   : > { %s136_s29 = sand.u32 (!%p131_p6), 1, %s795_s10  }
  0x36   : > { %134 = sbr.rel (%p131_p6) target bundleno = 154 (0x9a), region = 24  ;;  %s515_s30 = sshll.u32 (!%p131_p6), %s136_s29, 7 }
  0x37   : > { %s137_s14 = scalar_lea.sflag (!%p131_p6), [#allocation3], %s136_s29  ;;  %s973_s21 = scalar_lea.vmem (!%p131_p6), [#allocation2], %s515_s30 }
  0x3b   : > { %770 = dma.done.wait (%p919_p8), %s137_s14, 2048  }
  0x3c   : > { %772 = vsyncadd (%p919_p8), %s137_s14, 4294965248  ;;  %s156_s2 = sand.u32 1, %s783_s7   ;;  %p517_p5 = scmp.le.s32.totalorder %s803_s12, %s807_s13 }
  0x3d   : > { %s516_s19 = sshll.u32 %s156_s2, 7 }
  0x3e   : > { %s982_s20 = scalar_lea.vmem [#allocation5], %s516_s19  ;;  %166 = sbr.rel (%p517_p5) target bundleno = 76 (0x4c), region = 32 }
  0x43   : > { %v825_v0 = vmov 0.0  }
  0x44   : > { %167 = vst [vmem:[%s982_s20] sm:$0xff] %v825_v0  ;;  %168 = vst [vmem:[%s982_s20 + $0x8] sm:$0xff] %v825_v0 }
  0x45   : > { %169 = vst [vmem:[%s982_s20 + $0x10] sm:$0xff] %v825_v0  ;;  %170 = vst [vmem:[%s982_s20 + $0x18] sm:$0xff] %v825_v0 }
  0x46   : > { %171 = vst [vmem:[%s982_s20 + $0x20] sm:$0xff] %v825_v0  ;;  %172 = vst [vmem:[%s982_s20 + $0x28] sm:$0xff] %v825_v0 }
  0x47   : > { %173 = vst [vmem:[%s982_s20 + $0x30] sm:$0xff] %v825_v0  ;;  %174 = vst [vmem:[%s982_s20 + $0x38] sm:$0xff] %v825_v0 }
  0x48   : > { %175 = vst [vmem:[%s982_s20 + $0x40] sm:$0xff] %v825_v0  ;;  %176 = vst [vmem:[%s982_s20 + $0x48] sm:$0xff] %v825_v0 }
  0x49   : > { %177 = vst [vmem:[%s982_s20 + $0x50] sm:$0xff] %v825_v0  ;;  %178 = vst [vmem:[%s982_s20 + $0x58] sm:$0xff] %v825_v0 }
  0x4a   : > { %179 = vst [vmem:[%s982_s20 + $0x60] sm:$0xff] %v825_v0  ;;  %180 = vst [vmem:[%s982_s20 + $0x68] sm:$0xff] %v825_v0 }
  0x4b   : > { %181 = vst [vmem:[%s982_s20 + $0x70] sm:$0xff] %v825_v0  ;;  %182 = vst [vmem:[%s982_s20 + $0x78] sm:$0xff] %v825_v0 }
  0x4c PF: > { %p518_p8 = scmp.ge.s32.totalorder %s803_s12, %s807_s13 }
  0x4e   : > { %186 = sbr.rel (%p518_p8) target bundleno = 95 (0x5f), region = 36 }
  0x53   : > { %v187_v1 = vld [vmem:[%s973_s21] sm:$0xff]  ;;  %v188_v2 = vld [vmem:[%s973_s21 + $0x8] sm:$0xff]  ;;  %v189_v3 = vld [vmem:[%s973_s21 + $0x10] sm:$0xff]  ;;  %v826_v7 = vmov 0.0  }
  0x54   : > { %vm203_vm0 = vcmp.gt.f32.partialorder %v187_v1, 0.5  ;;  %vm204_vm1 = vcmp.gt.f32.partialorder %v188_v2, 0.5  ;;  %vm205_vm2 = vcmp.gt.f32.partialorder %v189_v3, 0.5  ;;  %v190_v4 = vld [vmem:[%s973_s21 + $0x18] sm:$0xff]  ;;  %v191_v5 = vld [vmem:[%s973_s21 + $0x20] sm:$0xff]  ;;  %v192_v6 = vld [vmem:[%s973_s21 + $0x28] sm:$0xff] }
  0x55   : > { %v519_v8 = vsel %vm203_vm0, 1.0, %v826_v7  ;;  %v520_v9 = vsel %vm204_vm1, 1.0, %v826_v7  ;;  %v521_v10 = vsel %vm205_vm2, 1.0, %v826_v7  ;;  %vm206_vm3 = vcmp.gt.f32.partialorder %v190_v4, 0.5  ;;  %v193_v11 = vld [vmem:[%s973_s21 + $0x30] sm:$0xff]  ;;  %v194_v12 = vld [vmem:[%s973_s21 + $0x38] sm:$0xff] }
  0x56   : > { %251 = vst [vmem:[%s982_s20] sm:$0xff] %v519_v8  ;;  %252 = vst [vmem:[%s982_s20 + $0x8] sm:$0xff] %v520_v9  ;;  %v522_v13 = vsel %vm206_vm3, 1.0, %v826_v7  ;;  %vm207_vm4 = vcmp.gt.f32.partialorder %v191_v5, 0.5  ;;  %vm208_vm5 = vcmp.gt.f32.partialorder %v192_v6, 0.5  ;;  %vm209_vm6 = vcmp.gt.f32.partialorder %v193_v11, 0.5  ;;  %v195_v14 = vld [vmem:[%s973_s21 + $0x40] sm:$0xff] }
  0x57   : > { %253 = vst [vmem:[%s982_s20 + $0x10] sm:$0xff] %v521_v10  ;;  %v196_v15 = vld [vmem:[%s973_s21 + $0x48] sm:$0xff]  ;;  %254 = vst [vmem:[%s982_s20 + $0x18] sm:$0xff] %v522_v13  ;;  %v523_v16 = vsel %vm207_vm4, 1.0, %v826_v7  ;;  %v524_v17 = vsel %vm208_vm5, 1.0, %v826_v7  ;;  %v525_v18 = vsel %vm209_vm6, 1.0, %v826_v7 }
  0x58   : > { %vm210_vm7 = vcmp.gt.f32.partialorder %v194_v12, 0.5  ;;  %v197_v19 = vld [vmem:[%s973_s21 + $0x50] sm:$0xff]  ;;  %v198_v20 = vld [vmem:[%s973_s21 + $0x58] sm:$0xff]  ;;  %255 = vst [vmem:[%s982_s20 + $0x20] sm:$0xff] %v523_v16  ;;  %256 = vst [vmem:[%s982_s20 + $0x28] sm:$0xff] %v524_v17  ;;  %vm211_vm8 = vcmp.gt.f32.partialorder %v195_v14, 0.5 }
  0x59   : > { %257 = vst [vmem:[%s982_s20 + $0x30] sm:$0xff] %v525_v18  ;;  %v526_v21 = vsel %vm210_vm7, 1.0, %v826_v7  ;;  %vm212_vm9 = vcmp.gt.f32.partialorder %v196_v15, 0.5  ;;  %vm213_vm10 = vcmp.gt.f32.partialorder %v197_v19, 0.5  ;;  %v199_v22 = vld [vmem:[%s973_s21 + $0x60] sm:$0xff]  ;;  %v200_v23 = vld [vmem:[%s973_s21 + $0x68] sm:$0xff] }
  0x5a   : > { %258 = vst [vmem:[%s982_s20 + $0x38] sm:$0xff] %v526_v21  ;;  %v527_v24 = vsel %vm211_vm8, 1.0, %v826_v7  ;;  %v528_v25 = vsel %vm212_vm9, 1.0, %v826_v7  ;;  %v529_v26 = vsel %vm213_vm10, 1.0, %v826_v7  ;;  %vm214_vm11 = vcmp.gt.f32.partialorder %v198_v20, 0.5  ;;  %v201_v27 = vld [vmem:[%s973_s21 + $0x70] sm:$0xff] }
  0x5b   : > { %v202_v28 = vld [vmem:[%s973_s21 + $0x78] sm:$0xff]  ;;  %259 = vst [vmem:[%s982_s20 + $0x40] sm:$0xff] %v527_v24  ;;  %260 = vst [vmem:[%s982_s20 + $0x48] sm:$0xff] %v528_v25  ;;  %v530_v29 = vsel %vm214_vm11, 1.0, %v826_v7  ;;  %vm215_vm12 = vcmp.gt.f32.partialorder %v199_v22, 0.5  ;;  %vm216_vm13 = vcmp.gt.f32.partialorder %v200_v23, 0.5 }
  0x5c   : > { %261 = vst [vmem:[%s982_s20 + $0x50] sm:$0xff] %v529_v26  ;;  %vm217_vm14 = vcmp.gt.f32.partialorder %v201_v27, 0.5  ;;  %262 = vst [vmem:[%s982_s20 + $0x58] sm:$0xff] %v530_v29  ;;  %v531_v30 = vsel %vm215_vm12, 1.0, %v826_v7  ;;  %v532_v31 = vsel %vm216_vm13, 1.0, %v826_v7  ;;  %vm218_vm15 = vcmp.gt.f32.partialorder %v202_v28, 0.5 }
  0x5d   : > { %v533_v32 = vsel %vm217_vm14, 1.0, %v826_v7  ;;  %263 = vst [vmem:[%s982_s20 + $0x60] sm:$0xff] %v531_v30  ;;  %264 = vst [vmem:[%s982_s20 + $0x68] sm:$0xff] %v532_v31  ;;  %v534_v33 = vsel %vm218_vm15, 1.0, %v826_v7 }
  0x5e   : > { %265 = vst [vmem:[%s982_s20 + $0x70] sm:$0xff] %v533_v32  ;;  %266 = vst [vmem:[%s982_s20 + $0x78] sm:$0xff] %v534_v33 }
  0x5f PF: > { %p535_p9 = scmp.ne.s32.totalorder %s803_s12, %s807_s13 }
  0x61   : > { %270 = sbr.rel (%p535_p9) target bundleno = 127 (0x7f), region = 40 }
  0x66   : > { %v271_v34 = vld [vmem:[%s973_s21] sm:$0xff]  ;;  %v335_v35 = vlaneseq  ;;  %v272_v36 = vld [vmem:[%s973_s21 + $0x8] sm:$0xff]  ;;  %v273_v37 = vld [vmem:[%s973_s21 + $0x10] sm:$0xff]  ;;  %v827_v41 = vmov 0.0  }
  0x67   : > { %vm287_vm0 = vcmp.gt.f32.partialorder %v271_v34, 0.5  ;;  %vm288_vm1 = vcmp.gt.f32.partialorder %v272_v36, 0.5  ;;  %vm289_vm2 = vcmp.gt.f32.partialorder %v273_v37, 0.5  ;;  %v274_v38 = vld [vmem:[%s973_s21 + $0x18] sm:$0xff]  ;;  %v275_v39 = vld [vmem:[%s973_s21 + $0x20] sm:$0xff]  ;;  %v276_v40 = vld [vmem:[%s973_s21 + $0x28] sm:$0xff] }
  0x68   : > { %v536_v42 = vsel %vm287_vm0, 1.0, %v827_v41  ;;  %v1045_v43 = vshrl.u32 %v335_v35, 7  ;;  %v1047_v44 = vand.u32 127, %v335_v35  ;;  %v537_v45 = vsel %vm288_vm1, 1.0, %v827_v41  ;;  %v277_v54 = vld [vmem:[%s973_s21 + $0x30] sm:$0xff]  ;;  %v278_v57 = vld [vmem:[%s973_s21 + $0x38] sm:$0xff] }
  0x69   : > { %v538_v46 = vsel %vm289_vm2, 1.0, %v827_v41  ;;  %vm290_vm3 = vcmp.gt.f32.partialorder %v274_v38, 0.5  ;;  %vm291_vm4 = vcmp.gt.f32.partialorder %v275_v39, 0.5  ;;  %vm292_vm5 = vcmp.gt.f32.partialorder %v276_v40, 0.5  ;;  %v279_v60 = vld [vmem:[%s973_s21 + $0x40] sm:$0xff]  ;;  %v280_v63 = vld [vmem:[%s973_s21 + $0x48] sm:$0xff] }
  0x6a   : > { %vm354_vm6 = vcmp.lt.s32.totalorder %v1047_v44, %v1045_v43  ;;  %v337_v47 = vadd.s32 8, %v1045_v43  ;;  %v338_v48 = vadd.s32 16, %v1045_v43  ;;  %v539_v49 = vsel %vm290_vm3, 1.0, %v827_v41  ;;  %v281_v6 = vld [vmem:[%s973_s21 + $0x50] sm:$0xff]  ;;  %v282_v9 = vld [vmem:[%s973_s21 + $0x58] sm:$0xff]  ;;  %v283_v12 = vld [vmem:[%s973_s21 + $0x60] sm:$0xff] }
  0x6b   : > { %v370_v50 = vsel %vm354_vm6, %v536_v42, 0.0  ;;  %v339_v51 = vadd.s32 24, %v1045_v43  ;;  %v540_v52 = vsel %vm291_vm4, 1.0, %v827_v41  ;;  %v340_v53 = vadd.s32 32, %v1045_v43  ;;  %v284_v15 = vld [vmem:[%s973_s21 + $0x68] sm:$0xff]  ;;  %v285_v22 = vld [vmem:[%s973_s21 + $0x70] sm:$0xff] }
  0x6c   : > { %386 = vst [vmem:[%s982_s20] sm:$0xff] %v370_v50  ;;  %vm355_vm7 = vcmp.lt.s32.totalorder %v1047_v44, %v337_v47  ;;  %vm356_vm8 = vcmp.lt.s32.totalorder %v1047_v44, %v338_v48  ;;  %v541_v55 = vsel %vm292_vm5, 1.0, %v827_v41  ;;  %v341_v56 = vadd.s32 40, %v1045_v43  ;;  %v286_v25 = vld [vmem:[%s973_s21 + $0x78] sm:$0xff] }
  0x6d   : > { %v371_v58 = vsel %vm355_vm7, %v537_v45, 0.0  ;;  %v372_v59 = vsel %vm356_vm8, %v538_v46, 0.0  ;;  %vm357_vm9 = vcmp.lt.s32.totalorder %v1047_v44, %v339_v51  ;;  %vm358_vm10 = vcmp.lt.s32.totalorder %v1047_v44, %v340_v53 }
  0x6e   : > { %387 = vst [vmem:[%s982_s20 + $0x8] sm:$0xff] %v371_v58  ;;  %388 = vst [vmem:[%s982_s20 + $0x10] sm:$0xff] %v372_v59  ;;  %v373_v61 = vsel %vm357_vm9, %v539_v49, 0.0  ;;  %v374_v62 = vsel %vm358_vm10, %v540_v52, 0.0  ;;  %vm359_vm11 = vcmp.lt.s32.totalorder %v1047_v44, %v341_v56  ;;  %vm293_vm12 = vcmp.gt.f32.partialorder %v277_v54, 0.5 }
  0x6f   : > { %389 = vst [vmem:[%s982_s20 + $0x18] sm:$0xff] %v373_v61  ;;  %390 = vst [vmem:[%s982_s20 + $0x20] sm:$0xff] %v374_v62  ;;  %v375_v0 = vsel %vm359_vm11, %v541_v55, 0.0  ;;  %v542_v1 = vsel %vm293_vm12, 1.0, %v827_v41  ;;  %v342_v2 = vadd.s32 48, %v1045_v43  ;;  %vm294_vm13 = vcmp.gt.f32.partialorder %v278_v57, 0.5 }
  0x70   : > { %391 = vst [vmem:[%s982_s20 + $0x28] sm:$0xff] %v375_v0  ;;  %v543_v3 = vsel %vm294_vm13, 1.0, %v827_v41  ;;  %v343_v4 = vadd.s32 56, %v1045_v43  ;;  %vm295_vm14 = vcmp.gt.f32.partialorder %v279_v60, 0.5  ;;  %v344_v5 = vadd.s32 64, %v1045_v43 }
  0x71   : > { %vm360_vm15 = vcmp.lt.s32.totalorder %v1047_v44, %v342_v2  ;;  %v544_v7 = vsel %vm295_vm14, 1.0, %v827_v41  ;;  %vm296_vm0 = vcmp.gt.f32.partialorder %v280_v63, 0.5  ;;  %v345_v8 = vadd.s32 72, %v1045_v43 }
  0x72   : > { %v376_v10 = vsel %vm360_vm15, %v542_v1, 0.0  ;;  %vm361_vm1 = vcmp.lt.s32.totalorder %v1047_v44, %v343_v4  ;;  %vm362_vm2 = vcmp.lt.s32.totalorder %v1047_v44, %v344_v5  ;;  %v545_v11 = vsel %vm296_vm0, 1.0, %v827_v41 }
  0x73   : > { %392 = vst [vmem:[%s982_s20 + $0x30] sm:$0xff] %v376_v10  ;;  %v377_v13 = vsel %vm361_vm1, %v543_v3, 0.0  ;;  %v378_v14 = vsel %vm362_vm2, %v544_v7, 0.0  ;;  %vm363_vm3 = vcmp.lt.s32.totalorder %v1047_v44, %v345_v8  ;;  %vm297_vm4 = vcmp.gt.f32.partialorder %v281_v6, 0.5 }
  0x74   : > { %393 = vst [vmem:[%s982_s20 + $0x38] sm:$0xff] %v377_v13  ;;  %394 = vst [vmem:[%s982_s20 + $0x40] sm:$0xff] %v378_v14  ;;  %v379_v16 = vsel %vm363_vm3, %v545_v11, 0.0  ;;  %v546_v17 = vsel %vm297_vm4, 1.0, %v827_v41  ;;  %v346_v18 = vadd.s32 80, %v1045_v43  ;;  %vm298_vm5 = vcmp.gt.f32.partialorder %v282_v9, 0.5 }
  0x75   : > { %395 = vst [vmem:[%s982_s20 + $0x48] sm:$0xff] %v379_v16  ;;  %v547_v19 = vsel %vm298_vm5, 1.0, %v827_v41  ;;  %v347_v20 = vadd.s32 88, %v1045_v43  ;;  %vm299_vm6 = vcmp.gt.f32.partialorder %v283_v12, 0.5  ;;  %v348_v21 = vadd.s32 96, %v1045_v43 }
  0x76   : > { %vm364_vm7 = vcmp.lt.s32.totalorder %v1047_v44, %v346_v18  ;;  %v548_v23 = vsel %vm299_vm6, 1.0, %v827_v41  ;;  %vm300_vm8 = vcmp.gt.f32.partialorder %v284_v15, 0.5  ;;  %v349_v24 = vadd.s32 104, %v1045_v43 }
  0x77   : > { %v380_v26 = vsel %vm364_vm7, %v546_v17, 0.0  ;;  %vm365_vm9 = vcmp.lt.s32.totalorder %v1047_v44, %v347_v20  ;;  %vm366_vm10 = vcmp.lt.s32.totalorder %v1047_v44, %v348_v21  ;;  %v549_v27 = vsel %vm300_vm8, 1.0, %v827_v41 }
  0x78   : > { %396 = vst [vmem:[%s982_s20 + $0x50] sm:$0xff] %v380_v26  ;;  %v381_v28 = vsel %vm365_vm9, %v547_v19, 0.0  ;;  %v382_v29 = vsel %vm366_vm10, %v548_v23, 0.0  ;;  %vm367_vm11 = vcmp.lt.s32.totalorder %v1047_v44, %v349_v24  ;;  %vm301_vm12 = vcmp.gt.f32.partialorder %v285_v22, 0.5 }
  0x79   : > { %397 = vst [vmem:[%s982_s20 + $0x58] sm:$0xff] %v381_v28  ;;  %398 = vst [vmem:[%s982_s20 + $0x60] sm:$0xff] %v382_v29  ;;  %v383_v30 = vsel %vm367_vm11, %v549_v27, 0.0  ;;  %v550_v31 = vsel %vm301_vm12, 1.0, %v827_v41  ;;  %v350_v32 = vadd.s32 112, %v1045_v43  ;;  %vm302_vm13 = vcmp.gt.f32.partialorder %v286_v25, 0.5 }
  0x7a   : > { %399 = vst [vmem:[%s982_s20 + $0x68] sm:$0xff] %v383_v30  ;;  %v551_v33 = vsel %vm302_vm13, 1.0, %v827_v41  ;;  %v351_v34 = vadd.s32 120, %v1045_v43 }
  0x7b   : > { %vm368_vm14 = vcmp.lt.s32.totalorder %v1047_v44, %v350_v32 }
  0x7c   : > { %v384_v35 = vsel %vm368_vm14, %v550_v31, 0.0  ;;  %vm369_vm15 = vcmp.lt.s32.totalorder %v1047_v44, %v351_v34 }
  0x7d   : > { %400 = vst [vmem:[%s982_s20 + $0x70] sm:$0xff] %v384_v35  ;;  %v385_v36 = vsel %vm369_vm15, %v551_v33, 0.0 }
  0x7e   : > { %401 = vst [vmem:[%s982_s20 + $0x78] sm:$0xff] %v385_v36 }
  0x7f PF: > { %s559_s24 = sshll.u32 %s807_s13, 5  ;;  %s418_s18 = sshll.u32 %s982_s20, 4  ;;  %s1125_s18 = int_to_ptr.vmem [resolvable:$true] %s418_s18 }
  0x80   : > { %s415_s27 = sadd.s32 %s803_s12, %s559_s24  ;;  %s1134_s25 = scalar_lea.sflag [#allocation4], %s156_s2 }
  0x81   : > { %s555_s22 = sshll.u32 %s415_s27, 7  ;;  %s699_s28 = scalar_lea.vmem %s1125_s18, 2048 }
  0x82   : > { %s1130_s23 = scalar_lea.hbm %s1195_s1, %s555_s22  ;;  %p700_p10 = scmp.ne.s32.totalorder %s1125_s18, %s699_s28 }
  0x83   : > { %s828_s12 = smov [#allocation5]  }
  0x84   : > { %p701_p11 = pnand %p700_p10, %p943_p1  ;;  %s703_s13 = sshll.u32 %s828_s12, 4  ;;  %s704_s13 = int_to_ptr.vmem [resolvable:$false] %s703_s13 }
  0x85   : > { %s705_s29 = scalar_lea.vmem %s704_s13, 4096  ;;  %p706_p13 = scmp.lt.s32.totalorder %s1125_s18, %s704_s13 }
  0x86   : > { %p702_p12 = pneg %p701_p11  ;;  %p707_p0 = scmp.lt.s32.totalorder %s705_s29, %s699_s28 }
  0x88   : > { %p708_p2 = por %p707_p0, %p706_p13 }
  0x8a   : > { %p709_p7 = pnand %p708_p2, %p702_p12 }
  0x8c   : > { %712 = shalt.err (!%p709_p7)
}
  0x8d   : > { %s713_s30 = scalar_lea.hbm %s1130_s23, 2048  ;;  %s717_s2 = scalar_lea.hbm %s1195_s1, 8192 }
  0x8e   : > { %p714_p3 = scmp.ne.s32.totalorder %s1130_s23, %s713_s30  ;;  %p718_p8 = scmp.lt.s32.totalorder %s1130_s23, %s1195_s1 }
  0x8f   : > { %p719_p9 = scmp.lt.s32.totalorder %s717_s2, %s713_s30 }
  0x90   : > { %p715_p6 = pnand %p714_p3, %p943_p1 }
  0x91   : > { %p720_p10 = por %p719_p9, %p718_p8 }
  0x92   : > { %p716_p5 = pneg %p715_p6 }
  0x94   : > { %p721_p11 = pnand %p720_p10, %p716_p5 }
  0x96   : > { %724 = shalt.err (!%p721_p11)
}
  0x97   : > { %s829_s24 = smov 128   ;;  %s830_s27 = smov 256  }
  0x98   : > { %s831_s22 = smov 8  }
  0x99   : > { %562 = dma.vmem_to_hbm [thread:$0]  (%p943_p1), %s1125_s18, 2048, %s1130_s23, %s1134_s25, %s829_s24, %s830_s27, %s831_s22  }
  0x9a PF: > { %p573_p12 = scmp.ge.s32.totalorder %s819_s16, 2  ;;  %s433_s17 = sand.u32 1, %s779_s6  }
  0x9b   : > { %s434_s26 = scalar_lea.sflag [#allocation4], %s433_s17 }
  0x9c   : > { %p569_p13 = pnand %p573_p12, %p950_p4 }
  0x9e   : > { %p570_p0 = pneg %p569_p13 }
  0xa0   : > { %774 = dma.done.wait (%p570_p0), %s434_s26, 2048  }
  0xa1   : > { %776 = vsyncadd (%p570_p0), %s434_s26, 4294965248  ;;  %s17_s16 = sadd.s32 1, %s819_s16   ;;  %s1207_s12 = sld [smem:[#allocation8_spill]] }
  0xa2   : > { %p14_p2 = scmp.ge.s32.totalorder %s17_s16, 6   ;;  %s1208_s14 = sld [smem:[#allocation9_spill]] }
  0xa3   : > { %s1209_s5 = sld [smem:[#allocation10_spill]]  ;;  %s1210_s6 = smov %s783_s7 }
  0xa4   : > { %s1211_s7 = smov %s787_s8  ;;  %s1212_s8 = smov %s938_s3 }
  0xa5   : > { %s1213_s9 = smov %s795_s10  ;;  %s1214_s10 = smov %s799_s11 }
  0xa6   : > { %s1215_s11 = smov %s941_s4  ;;  %s1216_s13 = smov %s815_s15 }
  0xa7   :  { %16 = sbr.rel (!%p14_p2) target bundleno = 9 (0x9), region = 81 }
  0xa9   : > { %s1217_s15 = smov %s1209_s5 }
  0xac   :  { %439 = vsyncpa [#allocation3], 1 }
  0xad   :  { %441 = vsyncpa [#allocation3 + $0x1], 1 }
  0xae   :  { %442 = vsyncpa [#allocation4], 1 }
  0xaf   :  { %444 = vsyncpa [#allocation4 + $0x1], 1 }

</bundles_post_ra>
